<compile_context>
chip_gen: v7x
topology: tpu7x:2x2x1
jax: 0.10.0
libtpu: 0.0.40
codegen_flags: <defaults>
</compile_context>

<pallas_src>
import jax
import jax.numpy as jnp
from jax.experimental import pallas as pl
from jax.experimental.pallas import tpu as pltpu


# ----------------------------- fused Pallas kernel ---------------------------

def fused_kernel(x_ref, w1_ref, w2_ref, w3_ref, consts_ref, conv_ref, pred_ref):
    """MLP(stacked proteins) -> 2x2 'same' conv over the implicit outer-product
    tensor -> 2x2 avg-pool -> global max -> sigmoid, all VMEM-resident."""
    L1, L2 = conv_ref.shape
    h = w1_ref.shape[1]
    h2 = w2_ref.shape[1]
    C = w3_ref.shape[1]
    f32 = jnp.float32
    bf16 = jnp.bfloat16

    # Packed constants: rows 0-3 = conv weight (4, C) with row = 2*dy + dx,
    # row 4 = b1, row 5 = b2, row 6 = b3, row 7[0] = conv bias.
    consts = consts_ref[...]
    w4 = consts[0:4, :C]
    b1 = consts[4:5, :h]
    b2 = consts[5:6, :h2]
    b3 = consts[6:7, :C]
    cb = consts[7:8, 0:1]

    # ---- shared 3-layer MLP on the pre-stacked (L1+L2, E) bf16 slab.
    # MXU operands bf16, accumulation f32; bias/ReLU stay f32 (v5e VPU).
    a = jnp.dot(x_ref[...], w1_ref[...], preferred_element_type=f32)
    a = jnp.maximum(a + b1, 0.0)
    a = jnp.dot(a.astype(bf16), w2_ref[...], preferred_element_type=f32)
    a = jnp.maximum(a + b2, 0.0)
    a = jnp.dot(a.astype(bf16), w3_ref[...], preferred_element_type=f32)
    a = jnp.maximum(a + b3, 0.0)                                   # (L1+L2, C) f32

    x1 = a[:L1]                                                    # (L1, C)
    x2 = a[L1:]                                                    # (L2, C)

    # ---- 2x2 'same' conv over the implicit outer product
    #   mat[c,i,j] = x1[i,c] * x2[j,c];  PyTorch 'same' (k=2) pads 0-before /
    #   1-after, so conv[i,j] = sum_{dy,dx,c} w[c,dy,dx]*x1[i+dy,c]*x2[j+dx,c]
    # with an implicit zero row/col past the end.  The +1 shifts are XLU rolls
    # (shift = L-1 == roll by -1) with the wrapped last row zeroed (= zero pad).
    ri1 = jax.lax.broadcasted_iota(jnp.int32, (L1, C), 0)
    ri2 = jax.lax.broadcasted_iota(jnp.int32, (L2, C), 0)
    x1s = jnp.where(ri1 < L1 - 1, pltpu.roll(x1, shift=L1 - 1, axis=0), 0.0)
    x2s = jnp.where(ri2 < L2 - 1, pltpu.roll(x2, shift=L2 - 1, axis=0), 0.0)

    # Pair the dy shifts on the VPU, then a SINGLE K=2C MXU push:
    #   conv = [a0 | a1] @ [x2 | x2s]^T        (K = 2C = 128 when C = 64)
    a0 = x1 * w4[0:1, :] + x1s * w4[2:3, :]                        # dx = 0 partner
    a1 = x1 * w4[1:2, :] + x1s * w4[3:4, :]                        # dx = 1 partner
    lhs = jnp.concatenate([a0, a1], axis=1).astype(bf16)           # (L1, 2C)
    rhs = jnp.concatenate([x2, x2s], axis=1).astype(bf16)          # (L2, 2C)
    dn = (((1,), (1,)), ((), ()))                                  # contract lanes
    conv = jax.lax.dot_general(lhs, rhs, dn, preferred_element_type=f32) + cb
    conv_ref[...] = conv                                           # (L1, L2) f32

    # ---- 2x2 avg-pool (stride 2) + global max + sigmoid, all f32, no matmul.
    # Row / column pairs via rolls; wrap-around garbage only ever lands in
    # positions that the validity mask removes from the max.
    t = conv + pltpu.roll(conv, shift=L1 - 1, axis=0)              # rows i + (i+1)
    q = t + pltpu.roll(t, shift=L2 - 1, axis=1)                    # cols j + (j+1)
    ri = jax.lax.broadcasted_iota(jnp.int32, (L1, L2), 0)
    cj = jax.lax.broadcasted_iota(jnp.int32, (L1, L2), 1)
    valid = ((ri % 2 == 0) & (ri < 2 * (L1 // 2))
             & (cj % 2 == 0) & (cj < 2 * (L2 // 2)))
    m = 0.25 * jnp.max(jnp.where(valid, q, -jnp.inf))
    # pred kept as a (1,1) VMEM block: vector-reduced scalars -> SMEM outputs
    # are not reliably lowered, and the 4-byte writeback is negligible.
    pred_ref[...] = jnp.broadcast_to(jax.nn.sigmoid(m), (1, 1))


# ----------------------------- wrappers ---------------------------------------

def _vmem_spec():
    return pl.BlockSpec(memory_space=pltpu.MemorySpace.VMEM)


def prepare_params(params):
    """One-time prep, hoisted out of the forward path: bf16 casts for the MXU
    weights and all tiny constants packed into a single (8, W) f32 tile
    (conv weight repacked (C,2,2)->(4,C) with row = 2*dy + dx; b1/b2/b3; cb)."""
    h = params["w1"].shape[1]
    h2 = params["w2"].shape[1]
    C = params["w3"].shape[1]
    W = max(h, h2, C)
    w4 = params["conv_w"].reshape(C, 4).T.astype(jnp.float32)      # (4, C)
    consts = jnp.zeros((8, W), jnp.float32)
    consts = consts.at[0:4, :C].set(w4)
    consts = consts.at[4, :h].set(params["b1"].reshape(-1).astype(jnp.float32))
    consts = consts.at[5, :h2].set(params["b2"].reshape(-1).astype(jnp.float32))
    consts = consts.at[6, :C].set(params["b3"].reshape(-1).astype(jnp.float32))
    consts = consts.at[7, 0].set(params["conv_b"].reshape(-1)[0].astype(jnp.float32))
    return {
        "w1": params["w1"].astype(jnp.bfloat16),
        "w2": params["w2"].astype(jnp.bfloat16),
        "w3": params["w3"].astype(jnp.bfloat16),
        "consts": consts,
    }


@jax.jit
def baseline2d_forward(protein1, protein2, prepped):
    L1 = protein1.shape[0]
    L2 = protein2.shape[0]
    # Pre-stack the proteins into one (L1+L2, E) bf16 slab: one DMA, no
    # in-kernel concat copy, half the input bytes (they are only MXU operands).
    x = jnp.concatenate([protein1.astype(jnp.bfloat16),
                         protein2.astype(jnp.bfloat16)], axis=0)
    conv2d, pred = pl.pallas_call(
        fused_kernel,
        out_shape=(jax.ShapeDtypeStruct((L1, L2), jnp.float32),
                   jax.ShapeDtypeStruct((1, 1), jnp.float32)),
        in_specs=[_vmem_spec() for _ in range(5)],
        out_specs=(_vmem_spec(), _vmem_spec()),
    )(x, prepped["w1"], prepped["w2"], prepped["w3"], prepped["consts"])
    # Free metadata reshapes to match the PyTorch return values.
    return pred.reshape(1), conv2d.reshape(1, 1, L1, L2)


# ----------------------------- pure-JAX reference ----------------------------

def reference_forward(protein1, protein2, params):
    def mlp(x):
        x = jax.nn.relu(x @ params["w1"] + params["b1"])
        x = jax.nn.relu(x @ params["w2"] + params["b2"])
        x = jax.nn.relu(x @ params["w3"] + params["b3"])
        return x

    x1 = mlp(protein1.astype(jnp.float32))
    x2 = mlp(protein2.astype(jnp.float32))
    mat = jnp.einsum("ik,jk->ijk", x1, x2)              # (L1, L2, C)
    mat = jnp.transpose(mat, (2, 0, 1))[None]           # (1, C, L1, L2)
    conv = jax.lax.conv_general_dilated(
        mat, params["conv_w"][None],                    # (1, C, 2, 2)
        window_strides=(1, 1),
        padding=((0, 1), (0, 1)),                       # PyTorch 'same' for k=2
        dimension_numbers=("NCHW", "OIHW", "NCHW")) + params["conv_b"]
    pooled = jax.lax.reduce_window(
        conv, 0.0, jax.lax.add, (1, 1, 2, 2), (1, 1, 2, 2), "VALID") / 4.0
    pred = jax.nn.sigmoid(jnp.max(pooled))[None]
    return pred, conv


# ----------------------------- parameter init --------------------------------

def init_params(key, embed_dim, h3=64, kernel_size=2):
    h = embed_dim // 4
    h2 = h // 4
    ks = jax.random.split(key, 8)

    def linear(kw, kb, fan_in, fan_out):
        bound = 1.0 / (float(fan_in) ** 0.5)
        w = jax.random.uniform(kw, (fan_in, fan_out), jnp.float32, -bound, bound)
        b = jax.random.uniform(kb, (1, fan_out), jnp.float32, -bound, bound)
        return w, b

    w1, b1 = linear(ks[0], ks[1], embed_dim, h)
    w2, b2 = linear(ks[2], ks[3], h, h2)
    w3, b3 = linear(ks[4], ks[5], h2, h3)
    cbound = 1.0 / (float(h3 * kernel_size * kernel_size) ** 0.5)
    conv_w = jax.random.uniform(ks[6], (h3, kernel_size, kernel_size),
                                jnp.float32, -cbound, cbound)
    conv_b = jax.random.uniform(ks[7], (1,), jnp.float32, -cbound, cbound)
    return {"w1": w1, "b1": b1, "w2": w2, "b2": b2, "w3": w3, "b3": b3,
            "conv_w": conv_w, "conv_b": conv_b}


# ----------------------------- main -------------------------------------------

if __name__ == "__main__":
    EMBED_DIM = 128      # -> h=32, h2=8, h3=64 (= C), so K = 2C = 128
    L1, L2 = 16, 16

    key = jax.random.PRNGKey(0)
    kp, k1, k2 = jax.random.split(key, 3)
    params = init_params(kp, EMBED_DIM)
    prepped = prepare_params(params)     # hoisted constant prep (packing, bf16 casts)

    protein1 = jax.random.normal(k1, (L1, EMBED_DIM), jnp.float32)
    protein2 = jax.random.normal(k2, (L2, EMBED_DIM), jnp.float32)

    pred, mat = jax.block_until_ready(
        baseline2d_forward(protein1, protein2, prepped))

    ref_pred, ref_mat = jax.block_until_ready(
        reference_forward(protein1, protein2, params))

    assert pred.shape == (1,) and mat.shape == (1, 1, L1, L2)
    assert jnp.allclose(pred, ref_pred, atol=2e-2, rtol=2e-2)
    assert jnp.allclose(mat, ref_mat, atol=2e-2, rtol=2e-2)

    print("KERNEL_OK")
</pallas_src>

<mosaic_0001>
module attributes {stable_mosaic.version = 11 : i64} {
  func.func @fused_kernel(%arg0: memref<32x128xbf16, #tpu.memory_space<vmem>>, %arg1: memref<128x32xbf16, #tpu.memory_space<vmem>>, %arg2: memref<32x8xbf16, #tpu.memory_space<vmem>>, %arg3: memref<8x64xbf16, #tpu.memory_space<vmem>>, %arg4: memref<8x64xf32, #tpu.memory_space<vmem>>, %arg5: memref<16x16xf32, #tpu.memory_space<vmem>>, %arg6: memref<1x1xf32, #tpu.memory_space<vmem>>) attributes {dimension_semantics = [], scalar_prefetch = 0 : i64, scratch_operands = 0 : i64, tpu.core_type = #tpu.core_type<tc>} {
    %c0 = arith.constant 0 : index
    %c0_0 = arith.constant 0 : index
    %0 = vector.load %arg4[%c0, %c0_0] : memref<8x64xf32, #tpu.memory_space<vmem>>, vector<8x64xf32>
    %1 = vector.extract_strided_slice %0 {offsets = [0, 0], sizes = [4, 64], strides = [1, 1]} : vector<8x64xf32> to vector<4x64xf32>
    %2 = vector.extract_strided_slice %0 {offsets = [4, 0], sizes = [1, 32], strides = [1, 1]} : vector<8x64xf32> to vector<1x32xf32>
    %3 = vector.extract_strided_slice %0 {offsets = [5, 0], sizes = [1, 8], strides = [1, 1]} : vector<8x64xf32> to vector<1x8xf32>
    %4 = vector.extract_strided_slice %0 {offsets = [6, 0], sizes = [1, 64], strides = [1, 1]} : vector<8x64xf32> to vector<1x64xf32>
    %5 = vector.extract_strided_slice %0 {offsets = [7, 0], sizes = [1, 1], strides = [1, 1]} : vector<8x64xf32> to vector<1x1xf32>
    %c0_1 = arith.constant 0 : index
    %c0_2 = arith.constant 0 : index
    %6 = vector.load %arg0[%c0_1, %c0_2] : memref<32x128xbf16, #tpu.memory_space<vmem>>, vector<32x128xbf16>
    %c0_3 = arith.constant 0 : index
    %c0_4 = arith.constant 0 : index
    %7 = vector.load %arg1[%c0_3, %c0_4] : memref<128x32xbf16, #tpu.memory_space<vmem>>, vector<128x32xbf16>
    %cst = arith.constant dense<0.000000e+00> : vector<32x32xf32>
    %8 = tpu.matmul %6, %7, %cst {dimension_numbers = #tpu.dot_dimension_numbers<[1], [0], [0], [1], [0, 0, 1, 1], [], []>} : vector<32x128xbf16>, vector<128x32xbf16>, vector<32x32xf32> -> vector<32x32xf32>
    %9 = vector.broadcast %2 : vector<1x32xf32> to vector<32x32xf32>
    %10 = arith.addf %8, %9 : vector<32x32xf32>
    %cst_5 = arith.constant 0.000000e+00 : f32
    %11 = vector.broadcast %cst_5 : f32 to vector<32x32xf32>
    %12 = arith.maximumf %10, %11 : vector<32x32xf32>
    %13 = arith.truncf %12 : vector<32x32xf32> to vector<32x32xbf16>
    %c0_6 = arith.constant 0 : index
    %c0_7 = arith.constant 0 : index
    %14 = vector.load %arg2[%c0_6, %c0_7] : memref<32x8xbf16, #tpu.memory_space<vmem>>, vector<32x8xbf16>
    %cst_8 = arith.constant dense<0.000000e+00> : vector<32x8xf32>
    %15 = tpu.matmul %13, %14, %cst_8 {dimension_numbers = #tpu.dot_dimension_numbers<[1], [0], [0], [1], [0, 0, 1, 1], [], []>} : vector<32x32xbf16>, vector<32x8xbf16>, vector<32x8xf32> -> vector<32x8xf32>
    %16 = vector.broadcast %3 : vector<1x8xf32> to vector<32x8xf32>
    %17 = arith.addf %15, %16 : vector<32x8xf32>
    %cst_9 = arith.constant 0.000000e+00 : f32
    %18 = vector.broadcast %cst_9 : f32 to vector<32x8xf32>
    %19 = arith.maximumf %17, %18 : vector<32x8xf32>
    %20 = arith.truncf %19 : vector<32x8xf32> to vector<32x8xbf16>
    %c0_10 = arith.constant 0 : index
    %c0_11 = arith.constant 0 : index
    %21 = vector.load %arg3[%c0_10, %c0_11] : memref<8x64xbf16, #tpu.memory_space<vmem>>, vector<8x64xbf16>
    %cst_12 = arith.constant dense<0.000000e+00> : vector<32x64xf32>
    %22 = tpu.matmul %20, %21, %cst_12 {dimension_numbers = #tpu.dot_dimension_numbers<[1], [0], [0], [1], [0, 0, 1, 1], [], []>} : vector<32x8xbf16>, vector<8x64xbf16>, vector<32x64xf32> -> vector<32x64xf32>
    %23 = vector.broadcast %4 : vector<1x64xf32> to vector<32x64xf32>
    %24 = arith.addf %22, %23 : vector<32x64xf32>
    %cst_13 = arith.constant 0.000000e+00 : f32
    %25 = vector.broadcast %cst_13 : f32 to vector<32x64xf32>
    %26 = arith.maximumf %24, %25 : vector<32x64xf32>
    %27 = vector.extract_strided_slice %26 {offsets = [0, 0], sizes = [16, 64], strides = [1, 1]} : vector<32x64xf32> to vector<16x64xf32>
    %28 = vector.extract_strided_slice %26 {offsets = [16, 0], sizes = [16, 64], strides = [1, 1]} : vector<32x64xf32> to vector<16x64xf32>
    %29 = tpu.iota {dimensions = array<i32: 0>} : vector<16x64xi32>
    %30 = tpu.iota {dimensions = array<i32: 0>} : vector<16x64xi32>
    %c15_i32 = arith.constant 15 : i32
    %31 = vector.broadcast %c15_i32 : i32 to vector<16x64xi32>
    %32 = arith.cmpi slt, %29, %31 : vector<16x64xi32>
    %c15_i32_14 = arith.constant 15 : i32
    %33 = tpu.dynamic_rotate %27 by %c15_i32_14 dim 0 : vector<16x64xf32>, i32 -> vector<16x64xf32>
    %cst_15 = arith.constant 0.000000e+00 : f32
    %34 = vector.broadcast %cst_15 : f32 to vector<16x64xf32>
    %35 = arith.select %32, %33, %34 : vector<16x64xi1>, vector<16x64xf32>
    %c15_i32_16 = arith.constant 15 : i32
    %36 = vector.broadcast %c15_i32_16 : i32 to vector<16x64xi32>
    %37 = arith.cmpi slt, %30, %36 : vector<16x64xi32>
    %c15_i32_17 = arith.constant 15 : i32
    %38 = tpu.dynamic_rotate %28 by %c15_i32_17 dim 0 : vector<16x64xf32>, i32 -> vector<16x64xf32>
    %cst_18 = arith.constant 0.000000e+00 : f32
    %39 = vector.broadcast %cst_18 : f32 to vector<16x64xf32>
    %40 = arith.select %37, %38, %39 : vector<16x64xi1>, vector<16x64xf32>
    %41 = vector.extract_strided_slice %1 {offsets = [0, 0], sizes = [1, 64], strides = [1, 1]} : vector<4x64xf32> to vector<1x64xf32>
    %42 = vector.broadcast %41 : vector<1x64xf32> to vector<16x64xf32>
    %43 = arith.mulf %27, %42 : vector<16x64xf32>
    %44 = vector.extract_strided_slice %1 {offsets = [2, 0], sizes = [1, 64], strides = [1, 1]} : vector<4x64xf32> to vector<1x64xf32>
    %45 = vector.broadcast %44 : vector<1x64xf32> to vector<16x64xf32>
    %46 = arith.mulf %35, %45 : vector<16x64xf32>
    %47 = arith.addf %43, %46 : vector<16x64xf32>
    %48 = vector.extract_strided_slice %1 {offsets = [1, 0], sizes = [1, 64], strides = [1, 1]} : vector<4x64xf32> to vector<1x64xf32>
    %49 = vector.broadcast %48 : vector<1x64xf32> to vector<16x64xf32>
    %50 = arith.mulf %27, %49 : vector<16x64xf32>
    %51 = vector.extract_strided_slice %1 {offsets = [3, 0], sizes = [1, 64], strides = [1, 1]} : vector<4x64xf32> to vector<1x64xf32>
    %52 = vector.broadcast %51 : vector<1x64xf32> to vector<16x64xf32>
    %53 = arith.mulf %35, %52 : vector<16x64xf32>
    %54 = arith.addf %50, %53 : vector<16x64xf32>
    %55 = tpu.concatenate %47, %54 in 1 : vector<16x64xf32>, vector<16x64xf32> -> vector<16x128xf32>
    %56 = arith.truncf %55 : vector<16x128xf32> to vector<16x128xbf16>
    %57 = tpu.concatenate %28, %40 in 1 : vector<16x64xf32>, vector<16x64xf32> -> vector<16x128xf32>
    %58 = arith.truncf %57 : vector<16x128xf32> to vector<16x128xbf16>
    %cst_19 = arith.constant dense<0.000000e+00> : vector<16x16xf32>
    %59 = tpu.matmul %56, %58, %cst_19 {dimension_numbers = #tpu.dot_dimension_numbers<[1], [1], [0], [0], [0, 0, 1, 0], [], []>} : vector<16x128xbf16>, vector<16x128xbf16>, vector<16x16xf32> -> vector<16x16xf32>
    %60 = vector.broadcast %5 : vector<1x1xf32> to vector<16x16xf32>
    %61 = arith.addf %59, %60 : vector<16x16xf32>
    %c0_20 = arith.constant 0 : index
    %c0_21 = arith.constant 0 : index
    %62 = vector.load %arg5[%c0_20, %c0_21] : memref<16x16xf32, #tpu.memory_space<vmem>>, vector<16x16xf32>
    tpu.vector_store %arg5[%c0_20, %c0_21], %61 {strides = array<i32>} : memref<16x16xf32, #tpu.memory_space<vmem>>, vector<16x16xf32>,
    %c15_i32_22 = arith.constant 15 : i32
    %63 = tpu.dynamic_rotate %61 by %c15_i32_22 dim 0 : vector<16x16xf32>, i32 -> vector<16x16xf32>
    %64 = arith.addf %61, %63 : vector<16x16xf32>
    %c15_i32_23 = arith.constant 15 : i32
    %65 = tpu.dynamic_rotate %64 by %c15_i32_23 dim 1 : vector<16x16xf32>, i32 -> vector<16x16xf32>
    %66 = arith.addf %64, %65 : vector<16x16xf32>
    %67 = tpu.iota {dimensions = array<i32: 0>} : vector<16x16xi32>
    %68 = tpu.iota {dimensions = array<i32: 1>} : vector<16x16xi32>
    %c2_i32 = arith.constant 2 : i32
    %c0_i32 = arith.constant 0 : i32
    %69 = arith.cmpi eq, %c2_i32, %c0_i32 : i32
    %c1_i32 = arith.constant 1 : i32
    %70 = arith.select %69, %c1_i32, %c2_i32 : i32
    %71 = vector.broadcast %70 : i32 to vector<16x16xi32>
    %72 = arith.remsi %67, %71 : vector<16x16xi32>
    %c0_i32_24 = arith.constant 0 : i32
    %73 = vector.broadcast %c0_i32_24 : i32 to vector<16x16xi32>
    %74 = arith.cmpi ne, %72, %73 : vector<16x16xi32>
    %c0_i32_25 = arith.constant 0 : i32
    %75 = vector.broadcast %c0_i32_25 : i32 to vector<16x16xi32>
    %76 = arith.cmpi slt, %72, %75 : vector<16x16xi32>
    %c0_i32_26 = arith.constant 0 : i32
    %77 = arith.cmpi slt, %70, %c0_i32_26 : i32
    %78 = vector.broadcast %77 : i1 to vector<16x16xi1>
    %79 = vector.broadcast %78 : vector<16x16xi1> to vector<16x16xi1>
    %80 = arith.xori %76, %79 : vector<16x16xi1>
    %81 = arith.andi %80, %74 : vector<16x16xi1>
    %82 = vector.broadcast %70 : i32 to vector<16x16xi32>
    %83 = arith.addi %72, %82 : vector<16x16xi32>
    %84 = arith.select %81, %83, %72 : vector<16x16xi1>, vector<16x16xi32>
    %c0_i32_27 = arith.constant 0 : i32
    %85 = vector.broadcast %c0_i32_27 : i32 to vector<16x16xi32>
    %86 = arith.cmpi eq, %84, %85 : vector<16x16xi32>
    %c16_i32 = arith.constant 16 : i32
    %87 = vector.broadcast %c16_i32 : i32 to vector<16x16xi32>
    %88 = arith.cmpi slt, %67, %87 : vector<16x16xi32>
    %89 = arith.andi %86, %88 : vector<16x16xi1>
    %c2_i32_28 = arith.constant 2 : i32
    %c0_i32_29 = arith.constant 0 : i32
    %90 = arith.cmpi eq, %c2_i32_28, %c0_i32_29 : i32
    %c1_i32_30 = arith.constant 1 : i32
    %91 = arith.select %90, %c1_i32_30, %c2_i32_28 : i32
    %92 = vector.broadcast %91 : i32 to vector<16x16xi32>
    %93 = arith.remsi %68, %92 : vector<16x16xi32>
    %c0_i32_31 = arith.constant 0 : i32
    %94 = vector.broadcast %c0_i32_31 : i32 to vector<16x16xi32>
    %95 = arith.cmpi ne, %93, %94 : vector<16x16xi32>
    %c0_i32_32 = arith.constant 0 : i32
    %96 = vector.broadcast %c0_i32_32 : i32 to vector<16x16xi32>
    %97 = arith.cmpi slt, %93, %96 : vector<16x16xi32>
    %c0_i32_33 = arith.constant 0 : i32
    %98 = arith.cmpi slt, %91, %c0_i32_33 : i32
    %99 = vector.broadcast %98 : i1 to vector<16x16xi1>
    %100 = vector.broadcast %99 : vector<16x16xi1> to vector<16x16xi1>
    %101 = arith.xori %97, %100 : vector<16x16xi1>
    %102 = arith.andi %101, %95 : vector<16x16xi1>
    %103 = vector.broadcast %91 : i32 to vector<16x16xi32>
    %104 = arith.addi %93, %103 : vector<16x16xi32>
    %105 = arith.select %102, %104, %93 : vector<16x16xi1>, vector<16x16xi32>
    %c0_i32_34 = arith.constant 0 : i32
    %106 = vector.broadcast %c0_i32_34 : i32 to vector<16x16xi32>
    %107 = arith.cmpi eq, %105, %106 : vector<16x16xi32>
    %108 = arith.andi %89, %107 : vector<16x16xi1>
    %c16_i32_35 = arith.constant 16 : i32
    %109 = vector.broadcast %c16_i32_35 : i32 to vector<16x16xi32>
    %110 = arith.cmpi slt, %68, %109 : vector<16x16xi32>
    %111 = arith.andi %108, %110 : vector<16x16xi1>
    %cst_36 = arith.constant 0xFF800000 : f32
    %112 = vector.broadcast %cst_36 : f32 to vector<16x16xf32>
    %113 = arith.select %111, %66, %112 : vector<16x16xi1>, vector<16x16xf32>
    %114 = vector.shape_cast %113 : vector<16x16xf32> to vector<1x16x16xf32>
    %cst_37 = arith.constant dense<0xFF800000> : vector<1xf32>
    %115 = vector.multi_reduction <maximumf>, %114, %cst_37 [1, 2] : vector<1x16x16xf32> to vector<1xf32>
    %116 = vector.shape_cast %115 : vector<1xf32> to vector<1x1x1xf32>
    %117 = vector.extract %116[0, 0, 0] : f32 from vector<1x1x1xf32>
    %cst_38 = arith.constant 2.500000e-01 : f32
    %118 = arith.mulf %cst_38, %117 : f32
    %119 = arith.negf %118 : f32
    %120 = math.exp %119 : f32
    %cst_39 = arith.constant 1.000000e+00 : f32
    %121 = arith.addf %cst_39, %120 : f32
    %122 = arith.divf %cst_39, %121 : f32
    %123 = vector.broadcast %122 : f32 to vector<1x1xf32>
    %c0_40 = arith.constant 0 : index
    %c0_41 = arith.constant 0 : index
    %124 = vector.load %arg6[%c0_40, %c0_41] : memref<1x1xf32, #tpu.memory_space<vmem>>, vector<1x1xf32>
    tpu.vector_store %arg6[%c0_40, %c0_41], %123 {strides = array<i32>} : memref<1x1xf32, #tpu.memory_space<vmem>>, vector<1x1xf32>,
    return
  }
}

</mosaic_0001>

<bundles_post_ra>
// kernel: baseline2d_forward.1
= control target key start
LH: loop header
LB: loop body
LE: loop exit
PB: predicated region body
PF: predicated region fallthrough
CT: control target
= control target key end

     0   :  { %12 = vsyncpa [#allocation3], 0  ;;  %s895_s0 = inlined_call_operand.vmem [shape: bf16[32,128], index: 0, kind: input, shape index: {}]   ;;  %s896_s1 = inlined_call_operand.vmem [shape: bf16[128,32], index: 1, kind: input, shape index: {}]   ;;  %s897_s2 = inlined_call_operand.vmem [shape: bf16[32,8], index: 2, kind: input, shape index: {}]   ;;  %s898_s3 = inlined_call_operand.vmem [shape: bf16[8,64], index: 3, kind: input, shape index: {}]   ;;  %s899_s4 = inlined_call_operand.vmem [shape: f32[8,64], index: 4, kind: input, shape index: {}]   ;;  %s900_s5 = inlined_call_operand.hbm [shape: f32[16,16], index: 5, kind: output, shape index: {0}]   ;;  %s901_s6 = inlined_call_operand.hbm [shape: f32[1,1], index: 6, kind: output, shape index: {1}]  }
   0x1   :  { %v673_v0 = vld [vmem:[%s896_s1] sm:$0xff]   ;;  %v674_v1 = vld [vmem:[%s896_s1 + $0x8] sm:$0xff]   ;;  %v675_v2 = vld [vmem:[%s896_s1 + $0x10] sm:$0xff]  }
   0x2   :  { %605 = vmatprep.subr.bf16.mxu0 %v673_v0  ;;  %v676_v3 = vld [vmem:[%s896_s1 + $0x18] sm:$0xff]   ;;  %v681_v4 = vld [vmem:[%s895_s0] sm:$0xff]  }
   0x3   :  { %606 = vmatpush3.bf16.msra.mxu0 %v673_v0  ;;  %621 = vmatprep.mubr.bf16.mxu0 %v681_v4 }
   0x4   :  { %607 = vmatprep.subr.bf16.mxu0 %v674_v1 }
   0x7   :  { %608 = vmatpush3.bf16.msra.mxu0 %v674_v1 }
   0x8   :  { %609 = vmatprep.subr.bf16.mxu0 %v675_v2 }
   0xb   :  { %610 = vmatpush3.bf16.msra.mxu0 %v675_v2 }
   0xc   :  { %13 = vsyncpa [#allocation5], 0  ;;  %611 = vmatprep.subr.bf16.mxu0 %v676_v3  ;;  %v677_v5 = vld [vmem:[%s896_s1 + $0x20] sm:$0xff]   ;;  %v678_v6 = vld [vmem:[%s896_s1 + $0x28] sm:$0xff]   ;;  %v46_v12 = vlaneseq  ;;  %vm185_vm0 = vcmask 261120   ;;  %vm259_vm1 = vcmask 1043456  }
   0xd   :  { %v679_v7 = vld [vmem:[%s896_s1 + $0x30] sm:$0xff]   ;;  %v680_v8 = vld [vmem:[%s896_s1 + $0x38] sm:$0xff]   ;;  %v682_v9 = vld [vmem:[%s895_s0 + $0x8] sm:$0xff]   ;;  %vm252_vm2 = vcmask 64512   ;;  %v737_v2 = vmov 0.0   ;;  %vm738_vm5 = vmmov 0  }
   0xe   :  { %v683_v10 = vld [vmem:[%s897_s2] sm:$0xff]   ;;  %v684_v11 = vld [vmem:[%s897_s2 + $0x8] sm:$0xff]   ;;  %v818_v13 = vshrl.u32 %v46_v12, 7  ;;  %vm370_vm6 = vcmask 523264   ;;  %vm431_vm7 = vcmask 130048   ;;  %s740_s22 = smov 16  }
   0xf   :  { %612 = vmatpush3.bf16.msra.mxu0 %v676_v3  ;;  %625 = vmatprep.subr.bf16.mxu1 %v683_v10  ;;  %v824_v15 = vld [vmem:[%s899_s4] sm:$0xff]  ;;  %vm440_vm8 = vcmask 1047680   ;;  %s741_s23 = smov 127   ;;  %s742_s27 = smov [#allocation2]  }
  0x10   :  { %613 = vmatprep.subr.bf16.mxu0 %v677_v5  ;;  %626 = vmatpush3.bf16.msra.mxu1 %v683_v10  ;;  %v48_v14 = vsub.s32 4, %v818_v13  ;;  %v247_v31 = vld [vmem:[%s898_s3] sm:$0xf]  ;;  %v171_v33 = vsub.s32 5, %v818_v13  ;;  %v250_v49 = vsub.s32 6, %v818_v13  ;;  %v336_v54 = vsub.s32 0, %v818_v13 }
  0x11   :  { %627 = vmatprep.subr.bf16.mxu1 %v684_v11  ;;  %v261_v32 = vsel %vm259_vm1, %v247_v31, 0  ;;  %v350_v55 = vsub.s32 1, %v818_v13  ;;  %v837_v58 = vadd.s32 8, %v818_v13  ;;  %v342_v59 = vsub.s32 2, %v818_v13  ;;  %s739_s3 = smov 64   ;;  %s545_s28 = sshll.u32 %s742_s27, 4  ;;  %s546_s28 = int_to_ptr.vmem [resolvable:$true] %s545_s28 }
  0x12   :  { %v49_v16 = vrot.slane %v824_v15, %v48_v14  ;;  %v172_v34 = vrot.slane %v824_v15, %v171_v33  ;;  %v251_v50 = vrot.slane %v824_v15, %v250_v49  ;;  %v356_v63 = vsub.s32 3, %v818_v13  ;;  %s689_s29 = scalar_lea.vmem %s546_s28, 256  ;;  %p694_p1 = scmp.lt.s32.totalorder %s546_s28, %s546_s28 }
  0x13   :  { %614 = vmatpush3.bf16.msra.mxu0 %v677_v5  ;;  %v337_v3 = vrot.slane %v824_v15, %v336_v54  ;;  %v351_v4 = vrot.slane %v824_v15, %v350_v55  ;;  %vm320_vm3 = vcmp.lt.s32.totalorder %v837_v58, 15  ;;  %vm323_vm4 = vcmp.lt.s32.totalorder %v818_v13, 7  ;;  %p690_p0 = scmp.ne.s32.totalorder %s546_s28, %s689_s29  ;;  %p695_p2 = scmp.lt.s32.totalorder %s689_s29, %s689_s29 }
  0x14   :  { %615 = vmatprep.subr.bf16.mxu0 %v678_v6  ;;  %628 = vmatpush3.bf16.msra.mxu1 %v684_v11  ;;  %v357_v10 = vrot.slane %v824_v15, %v356_v63 }
  0x15   :  { %645 = vmatprep.subr.msk.bf16.mxu1 %vm259_vm1, %v247_v31  ;;  %v386_v31 = vrot.slane %v824_v15, 7  ;;  %p696_p3 = por %p695_p2, %p694_p1 }
  0x17   :  { %616 = vmatpush3.bf16.msra.mxu0 %v678_v6  ;;  %646 = vpush %v386_v31  ;;  %p697_p4 = pnand %p696_p3, %p690_p0 }
  0x18   :  { %617 = vmatprep.subr.bf16.mxu0 %v679_v7 }
  0x1b   :  { %618 = vmatpush3.bf16.msra.mxu0 %v679_v7 }
  0x1c   :  { %619 = vmatprep.subr.bf16.mxu0 %v680_v8 }
  0x1f   :  { %620 = vmatpush3.bf16.msra.mxu0 %v680_v8 }
  0x22   :  { %622 = vmatmul.mubr.bf16.vlgmr.msra.gmra.mrb[0].mxu0 %v682_v9  ;;  %v343_v9 = vrot.slane %v824_v15, %v342_v59 }
  0x48   :  { %s647_s21 = spop %646 }
  0xf5   :  { %v623_v17 = vpop.f32.mrb[0].mxu0 }
  0xf6   :  { %v153_v18 = vadd.f32 %v623_v17, %v49_v16  ;;  %v144_v19 = vpop.f32.mrb[1].mxu0 }
  0xf7   :  { %v145_v20 = vadd.f32 %v144_v19, %v49_v16  ;;  %v624_v21 = vpop.f32.mrb[2].mxu0 }
  0xf8   :  { %v156_v22 = vadd.f32 %v624_v21, %v49_v16  ;;  %v147_v23 = vpop.f32.mrb[3].mxu0  ;;  %v161_v25 = vmax.f32 %v153_v18, 0.0 }
  0xf9   :  { %v148_v24 = vadd.f32 %v147_v23, %v49_v16  ;;  %v159_v27 = vmax.f32 %v145_v20, 0.0 }
  0xfa   :  { %v162_v26 = vmax.f32 %v156_v22, 0.0 }
  0xfb   :  { %v160_v28 = vmax.f32 %v148_v24, 0.0 }
  0xfc   :  { %v164_v29 = vpack.c.bf16 %v162_v26, %v161_v25 }
  0xfd   :  { %v163_v30 = vpack.c.bf16 %v160_v28, %v159_v27 }
  0xff   :  { %629 = vmatprep.mubr.msk.bf16.mxu1 %vm185_vm0, %v163_v30 }
 0x100   :  { %630 = vmatmul.mubr.msk.bf16.vlgmr.msra.gmra.mrb[0].mxu1 %vm185_vm0, %v164_v29 }
 0x101   :  { %634 = vmatpush3.bf16.msra.mxu1 %v261_v32 }
 0x102   :  { %639 = vmatprep.subr.bf16.mxu1 %v737_v2 }
 0x1d3   :  { %v631_v35 = vpop.f32.mrb[0].mxu1 }
 0x1d4   :  { %v235_v36 = vadd.f32 %v631_v35, %v172_v34  ;;  %v226_v37 = vpop.f32.mrb[1].mxu1 }
 0x1d5   :  { %v227_v38 = vadd.f32 %v226_v37, %v172_v34  ;;  %v632_v39 = vpop.f32.mrb[2].mxu1 }
 0x1d6   :  { %v238_v40 = vadd.f32 %v632_v39, %v172_v34  ;;  %v229_v41 = vpop.f32.mrb[3].mxu1  ;;  %v243_v43 = vmax.f32 %v235_v36, 0.0 }
 0x1d7   :  { %v230_v42 = vadd.f32 %v229_v41, %v172_v34  ;;  %v241_v45 = vmax.f32 %v227_v38, 0.0 }
 0x1d8   :  { %v244_v44 = vmax.f32 %v238_v40, 0.0 }
 0x1d9   :  { %v242_v46 = vmax.f32 %v230_v42, 0.0 }
 0x1da   :  { %v246_v47 = vpack.c.bf16 %v244_v44, %v243_v43 }
 0x1db   :  { %v245_v48 = vpack.c.bf16 %v242_v46, %v241_v45 }
 0x1dd   :  { %635 = vmatprep.mubr.msk.bf16.mxu1 %vm252_vm2, %v245_v48  ;;  %v388_v48 = vstv %s647_s21 }
 0x1de   :  { %636 = vmatmul.mubr.msk.bf16.vlgmr.msra.gmra.mrb[4].mxu1 %vm252_vm2, %v246_v47 }
 0x1df   :  { %641 = vmatprep.mubr.msk.bf16.mxu1 %vm738_vm5, %v737_v2 }
 0x2b1   :  { %v637_v51 = vpop.f32.mrb[4].mxu1 }
 0x2b2   :  { %v306_v52 = vadd.f32 %v637_v51, %v251_v50  ;;  %v297_v53 = vpop.f32.mrb[5].mxu1 }
 0x2b3   :  { %v298_v56 = vadd.f32 %v297_v53, %v251_v50  ;;  %v638_v57 = vpop.f32.mrb[6].mxu1 }
 0x2b4   :  { %v314_v60 = vmax.f32 %v306_v52, 0.0  ;;  %v309_v61 = vadd.f32 %v638_v57, %v251_v50  ;;  %v300_v62 = vpop.f32.mrb[7].mxu1 }
 0x2b5   :  { %v312_v0 = vmax.f32 %v298_v56, 0.0  ;;  %v301_v1 = vadd.f32 %v300_v62, %v251_v50 }
 0x2b6   :  { %v315_v5 = vmax.f32 %v309_v61, 0.0  ;;  %v328_v7 = vrot.slane %v314_v60, 1 }
 0x2b7   :  { %v313_v6 = vmax.f32 %v301_v1, 0.0  ;;  %v321_v11 = vrot.slane %v312_v0, 1  ;;  %v338_v16 = vmul.f32 %v337_v3, %v312_v0  ;;  %v352_v17 = vmul.f32 %v351_v4, %v312_v0 }
 0x2b8   :  { %v329_v8 = vrot.slane %v315_v5, 1 }
 0x2b9   :  { %v322_v14 = vrot.slane %v313_v6, 1  ;;  %v339_v20 = vmul.f32 %v337_v3, %v313_v6  ;;  %v353_v28 = vmul.f32 %v351_v4, %v313_v6  ;;  %v464_v6 = vand.u32 127, %v46_v12 }
 0x2ba   :  { %v330_v18 = vsel %vm323_vm4, %v328_v7, %v329_v8  ;;  %v331_v19 = vsel %vm323_vm4, %v329_v8, %v328_v7  ;;  %v469_v7 = vand.u32 1, %v818_v13 }
 0x2bb   :  { %v333_v21 = vsel %vm320_vm3, %v331_v19, 0.0  ;;  %v325_v22 = vsel %vm323_vm4, %v322_v14, %v321_v11  ;;  %v324_v23 = vsel %vm323_vm4, %v321_v11, %v322_v14  ;;  %v499_v8 = vand.u32 1, %v464_v6 }
 0x2bc   :  { %v663_v24 = vpack.i.bf16 %v333_v21, %v330_v18  ;;  %v327_v25 = vsel %vm320_vm3, %v325_v22, 0.0  ;;  %v358_v26 = vmul.f32 %v357_v10, %v324_v23  ;;  %v344_v27 = vmul.f32 %v343_v9, %v324_v23 }
 0x2bd   :  { %v345_v29 = vmul.f32 %v343_v9, %v327_v25  ;;  %v359_v30 = vmul.f32 %v357_v10, %v327_v25  ;;  %v476_v9 = vand.u32 1, %v837_v58  ;;  %vm489_vm9 = vcmp.eq.s32.totalorder %v469_v7, 0 }
 0x2be   :  { %664 = vrot.lane.b32.xlu0 %v663_v24, %s739_s3  ;;  %v360_v32 = vadd.f32 %v358_v26, %v352_v17  ;;  %v346_v33 = vadd.f32 %v344_v27, %v338_v16  ;;  %vm507_vm10 = vcmp.eq.s32.totalorder %v499_v8, 0  ;;  %vm510_vm13 = vcmp.lt.s32.totalorder %v464_v6, 16 }
 0x2bf   :  { %v347_v34 = vadd.f32 %v345_v29, %v339_v20  ;;  %v361_v35 = vadd.f32 %v359_v30, %v353_v28  ;;  %vm490_vm11 = vcmp.eq.s32.totalorder %v476_v9, 0  ;;  %vm508_vm12 = vmand %vm489_vm9, %vm507_vm10 }
 0x2c0   :  { %vm509_vm14 = vmand %vm490_vm11, %vm507_vm10 }
 0x2c1   :  { %v668_v36 = vpack.i.bf16 %v361_v35, %v360_v32  ;;  %vm511_vm15 = vmand %vm508_vm12, %vm510_vm13 }
 0x2c2   :  { %vm512_vm0 = vmand %vm509_vm14, %vm510_vm13 }
 0x2c3   :  { %669 = vrot.lane.b32.xlu0 %v668_v36, %s739_s3 }
 0x330   :  { %v665_v37 = vpop.permute.xlu0 %664 }
 0x331   :  { %v667_v38 = vunpack.i.h.bf16 %v665_v37  ;;  %v666_v39 = vunpack.i.l.bf16 %v665_v37 }
 0x333   :  { %v383_v40 = vsel %vm370_vm6, %v315_v5, %v667_v38  ;;  %v382_v41 = vsel %vm370_vm6, %v314_v60, %v666_v39 }
 0x334   :  { %v384_v42 = vpack.c.bf16 %v383_v40, %v382_v41 }
 0x335   :  { %v670_v43 = vpop.permute.xlu0 %669 }
 0x336   :  { %v672_v44 = vunpack.i.h.bf16 %v670_v43  ;;  %v671_v45 = vunpack.i.l.bf16 %v670_v43  ;;  %640 = vmatpush3.bf16.xpose.msra.mxu1 %v384_v42 }
 0x338   :  { %v372_v15 = vsel %vm370_vm6, %v347_v34, %v672_v44  ;;  %v371_v46 = vsel %vm370_vm6, %v346_v33, %v671_v45 }
 0x339   :  { %v373_v47 = vpack.c.bf16 %v372_v15, %v371_v46 }
 0x33d   :  { %642 = vmatmul.mubr.bf16.vlgmr.msra.gmra.mrb[8].mxu1 %v373_v47 }
 0x410   :  { %v424_v49 = vpop.f32.mrb[8].mxu1 }
 0x411   :  { %v425_v50 = vadd.f32 %v424_v49, %v388_v48  ;;  %v643_v51 = vpop.f32.mrb[9].mxu1 }
 0x412   :  { %v427_v52 = vpop.f32.mrb[10].mxu1 }
 0x413   :  { %432 = vst.msk [vmem:[#allocation2] sm:$0xff] %vm431_vm7, %v425_v50  ;;  %v428_v53 = vadd.f32 %v427_v52, %v388_v48  ;;  %v644_v54 = vpop.f32.mrb[11].mxu1  ;;  %v434_v55 = vrot.slane %v425_v50, 1 }
 0x415   :  { %433 = vst.msk [vmem:[#allocation2 + $0x8] sm:$0xff] %vm431_vm7, %v428_v53  ;;  %v435_v56 = vrot.slane %v428_v53, 1 }
 0x417   :  { %v437_v57 = vsel %vm323_vm4, %v435_v56, %v434_v55  ;;  %v436_v59 = vsel %vm323_vm4, %v434_v55, %v435_v56 }
 0x418   :  { %v439_v60 = vadd.f32 %v437_v57, %v428_v53  ;;  %v438_v61 = vadd.f32 %v436_v59, %v425_v50 }
 0x41a   :  { %441 = vrot.lane.b32.xlu1 %v438_v61, %s740_s22 }
 0x41e   :  { %444 = vrot.lane.b32.xlu1 %v439_v60, %s740_s22 }
 0x48c   :  { %v442_v62 = vpop.permute.xlu1 %441 }
 0x48d   :  { %v443_v63 = vsel %vm440_vm8, %v442_v62, %v438_v61 }
 0x48e   :  { %447 = vrot.lane.b32.xlu0 %v443_v63, %s740_s22 }
 0x490   :  { %v445_v0 = vpop.permute.xlu1 %444 }
 0x491   :  { %v446_v1 = vsel %vm440_vm8, %v445_v0, %v439_v60 }
 0x492   :  { %449 = vrot.lane.b32.xlu1 %v446_v1, %s740_s22 }
 0x500   :  { %v448_v2 = vpop.permute.xlu0 %447 }
 0x501   :  { %v451_v3 = vsel %vm440_vm8, %v448_v2, %v438_v61 }
 0x502   :  { %455 = vrot.lane.b32.xlu0 %v451_v3, %s741_s23 }
 0x504   :  { %v450_v4 = vpop.permute.xlu1 %449 }
 0x505   :  { %v452_v5 = vsel %vm440_vm8, %v450_v4, %v439_v60 }
 0x506   :  { %457 = vrot.lane.b32.xlu1 %v452_v5, %s741_s23 }
 0x574   :  { %v456_v10 = vpop.permute.xlu0 %455 }
 0x575   :  { %v461_v11 = vadd.f32 %v456_v10, %v438_v61 }
 0x577   :  { %v513_v16 = vsel %vm511_vm15, %v461_v11, -inf }
 0x578   :  { %v458_v14 = vpop.permute.xlu1 %457  ;;  %v515_v12 = vsel %vm431_vm7, %v513_v16, -inf }
 0x579   :  { %v462_v17 = vadd.f32 %v458_v14, %v439_v60 }
 0x57b   :  { %v514_v18 = vsel %vm512_vm0, %v462_v17, -inf }
 0x57c   :  { %v516_v13 = vsel %vm431_vm7, %v514_v18, -inf }
 0x57d   :  { %v517_v19 = vmax.f32 %v515_v12, %v516_v13 }
 0x57f   :  { %518 = vmax.xlane.f32.xlu0 %v517_v19 }
 0x60c   :  { %v519_v58 = vpop.xlane.xlu0 %518 }
 0x60d   :  { %v520_v20 = vrot.slane %v519_v58, 4 }
 0x60f   :  { %v521_v21 = vmax.f32 %v519_v58, %v520_v20 }
 0x611   :  { %v522_v22 = vrot.slane %v521_v21, 2 }
 0x613   :  { %v523_v23 = vmax.f32 %v521_v21, %v522_v22 }
 0x615   :  { %v524_v24 = vrot.slane %v523_v23, 1 }
 0x617   :  { %v525_v25 = vmax.f32 %v523_v23, %v524_v24 }
 0x619   :  { %648 = vpush %v525_v25 }
 0x64a   :  { %s649_s24 = spop %648 }
 0x64b   :  { %s527_s25 = smul.f32 0.25, %s649_s24 }
 0x64d   :  { %s528_s26 = sxor.u32 2147483648, %s527_s25 }
 0x64e   :  { %v529_v26 = vstv %s528_s26 }
 0x64f   :  { %v530_v27 = vmul.f32 1.442695, %v529_v26 }
 0x651   :  { %685 = vpow2.f32 %v530_v27 }
 0x652   :  { %700 = shalt.err (!%p697_p4)
}
 0x653   :  { %s701_s8 = scalar_lea.hbm %s900_s5, 256 }
 0x654   :  { %p702_p5 = scmp.ne.s32.totalorder %s900_s5, %s701_s8  ;;  %p705_p6 = scmp.lt.u32.totalorder %s701_s8, %s900_s5 }
 0x656   :  { %p707_p7 = pnand %p705_p6, %p702_p5 }
 0x658   :  { %710 = shalt.err (!%p707_p7)
}
 0x659   :  { %s743_s13 = smov 128   ;;  %s744_s14 = smov 8   ;;  %vm538_vm1 = vcmask 0  }
 0x65a   :  { %551 = dma.vmem_to_hbm [thread:$0]  %s546_s28, 256, %s900_s5, [#allocation3], %s743_s13, %s743_s13, %s744_s14  }
 0x65b   :  { %v686_v28 = vpop.eup %685  ;;  %s745_s19 = smov [#allocation4]  }
 0x65c   :  { %650 = vpush %v686_v28  ;;  %s558_s20 = sshll.u32 %s745_s19, 4  ;;  %s559_s20 = int_to_ptr.vmem [resolvable:$true] %s558_s20 }
 0x65d   :  { %s711_s1 = scalar_lea.vmem %s559_s20, 16  ;;  %s715_s2 = scalar_lea.vmem %s559_s20, 32 }
 0x65e   :  { %p712_p8 = scmp.ne.s32.totalorder %s559_s20, %s711_s1  ;;  %p716_p9 = scmp.lt.s32.totalorder %s559_s20, %s559_s20 }
 0x65f   :  { %p717_p10 = scmp.lt.s32.totalorder %s715_s2, %s711_s1 }
 0x661   :  { %p718_p11 = por %p717_p10, %p716_p9 }
 0x663   :  { %p719_p12 = pnand %p718_p11, %p712_p8 }
 0x68d   :  { %s651_s17 = spop %650 }
 0x68e   :  { %s533_s18 = sadd.f32 1.0, %s651_s17 }
 0x690   :  { %v534_v29 = vstv %s533_s18 }
 0x691   :  { %687 = vrcp.f32 %v534_v29 }
 0x69b   :  { %v688_v30 = vpop.eup %687 }
 0x69c   :  { %652 = vpush %v688_v30 }
 0x6cd   :  { %s653_s0 = spop %652 }
 0x6ce   :  { %v537_v31 = vstv %s653_s0 }
 0x6cf   :  { %539 = vst.msk [vmem:[#allocation4] sm:$0x1] %vm538_vm1, %v537_v31 }
 0x6d0   :  { %722 = shalt.err (!%p719_p12)
}
 0x6d1   :  { %s723_s3 = scalar_lea.hbm %s901_s6, 16 }
 0x6d2   :  { %p724_p13 = scmp.ne.s32.totalorder %s901_s6, %s723_s3  ;;  %p727_p0 = scmp.lt.u32.totalorder %s723_s3, %s901_s6 }
 0x6d4   :  { %p729_p1 = pnand %p727_p0, %p724_p13 }
 0x6d6   :  { %732 = shalt.err (!%p729_p1)
}
 0x6d7   :  { %561 = dma.vmem_to_hbm [thread:$0]  %s559_s20, 16, %s901_s6, [#allocation5]  }
 0x6d8   :  { %733 = dma.done.wait [#allocation3], 256  }
 0x6d9   :  { %734 = vsyncadd [#allocation3], 4294967040 }
 0x6da   :  { %735 = dma.done.wait [#allocation5], 16  }
 0x6db   :  { %736 = vsyncadd [#allocation5], 4294967280 }
 0x6dc   :  { %568 = vsyncpa [#allocation3], 1 }
 0x6dd   :  { %569 = vsyncpa [#allocation5], 1 }

</bundles_post_ra>
